<compile_context>
chip_gen: v5e
topology: v5e:2x2
jax: 0.10.0
libtpu: 0.0.40
codegen_flags: <defaults>
</compile_context>

<pallas_src>
import functools

import jax
import jax.numpy as jnp
from jax.experimental import pallas as pl
from jax.experimental.pallas import tpu as pltpu


# ----------------------------- Pallas kernel ------------------------------ #
def _layernorm_kernel(alpha_ref, bias_ref, x_ref, o_ref, *, eps):
    # alpha_ref / bias_ref: SMEM scalars (shape (1,))
    # x_ref / o_ref: VMEM tiles of shape (TILE_R, D)
    x = x_ref[...].astype(jnp.float32)
    d = x.shape[-1]

    mean = jnp.mean(x, axis=-1, keepdims=True)
    # torch.std() defaults to the unbiased estimator (divide by N-1).
    denom = max(d - 1, 1)
    var = jnp.sum(jnp.square(x - mean), axis=-1, keepdims=True) / denom
    std = jnp.sqrt(var)

    alpha = alpha_ref[0]
    bias = bias_ref[0]
    # Exact divide (kernel is HBM-bound; EUP slack makes this free) with alpha
    # folded into the per-row scale -> one fused mul-add per element.
    scale = alpha / (std + eps)                     # (TILE_R, 1)
    # Recompute (x - mean) in the epilogue instead of keeping `centered` live
    # across the reduction (halves the live f32 (TILE_R, D) temporaries).
    o_ref[...] = ((x - mean) * scale + bias).astype(o_ref.dtype)


# ----------------------------- tiling helpers ------------------------------ #
def _vmem_capacity_bytes():
    try:
        return int(pltpu.get_tpu_info().vmem_capacity_bytes)
    except Exception:
        return 64 << 20  # conservative (v7x per-TC VMEM)


def _pick_tile_r(n_rows, d, dtype, vmem_bytes):
    """Pick a large, sublane-aligned row tile that exactly divides n_rows."""
    itemsize = jnp.dtype(dtype).itemsize
    sub = max(8, 32 // itemsize)                 # f32: 8, bf16: 16, int8/fp8: 32
    if n_rows % sub != 0:
        # Full-extent single block is always legal; only tiny/odd shapes hit this.
        return int(n_rows), 1

    row_bytes = max(1, d * itemsize)
    # Generation-aware block target: ~VMEM/16, clamped to [1 MiB, 8 MiB].
    #   v5e/v6e (128 MiB VMEM) -> 8 MiB blocks; v7x (64 MiB VMEM) -> 4 MiB blocks.
    target_bytes = max(1 << 20, min(8 << 20, vmem_bytes // 16))
    target_rows = max(sub, (target_bytes // row_bytes) // sub * sub)

    q = n_rows // sub                            # number of sublane groups
    max_groups = max(1, min(q, target_rows // sub))

    # Largest divisor of q that fits the target -> exact tiling: no ragged
    # block, no jnp.pad / slice passes, aliasing donation stays effective.
    best = 1
    g = 1
    while g * g <= q:
        if q % g == 0:
            for cand in (g, q // g):
                if cand <= max_groups and best < cand:
                    best = cand
        g += 1
    tile_r = best * sub
    num_tiles = n_rows // tile_r

    # Pathological row counts (no decent divisor): fall back to a ragged final
    # block. Rows are independent and Pallas drops out-of-bounds writes of the
    # partial last block, so valid rows are never contaminated.
    if tile_r * 4 < min(target_rows, n_rows):
        tile_r = min(target_rows, n_rows)
        num_tiles = -(-n_rows // tile_r)

    # Prefer >= 2 balanced tiles so v7x's two TensorCores both get work.
    if num_tiles == 1 and q % 2 == 0 and q >= 2:
        tile_r = (q // 2) * sub
        num_tiles = 2
    return int(tile_r), int(num_tiles)


# ------------------------------ wrapper ------------------------------------ #
def layer_norm_pallas(x, alpha, bias, eps=1e-6):
    """x: (..., D) -> layer-normalized, matching the PyTorch LayerNormalization.

    Note: the activation buffer is donated in place (input_output_aliases);
    callers that reuse `x` afterwards get a defensive XLA copy (perf-only).
    """
    orig_shape = x.shape
    D = orig_shape[-1]
    R = 1
    for s in orig_shape[:-1]:
        R *= s
    x2 = x.reshape(R, D)

    vmem_cap = _vmem_capacity_bytes()
    tile_r, num_tiles = _pick_tile_r(R, D, x.dtype, vmem_cap)

    itemsize = jnp.dtype(x.dtype).itemsize
    io_tile = tile_r * D * itemsize
    f32_tile = tile_r * D * 4
    # 2x double-buffered input + 2x double-buffered output (io dtype) + f32 temps.
    budget = 4 * io_tile + 2 * f32_tile + (2 << 20)
    vmem_limit = int(min(max(budget, 32 << 20), max(32 << 20, vmem_cap - (8 << 20))))

    cost = pl.CostEstimate(
        flops=7 * R * D,                          # mean/center/sq/sum/scale/fma
        transcendentals=2 * R,                    # sqrt + divide per row
        bytes_accessed=2 * R * D * itemsize + 8,
    )

    out = pl.pallas_call(
        functools.partial(_layernorm_kernel, eps=eps),
        out_shape=jax.ShapeDtypeStruct((R, D), x.dtype),
        grid=(num_tiles,),
        in_specs=[
            pl.BlockSpec(memory_space=pltpu.SMEM),            # alpha (scalar)
            pl.BlockSpec(memory_space=pltpu.SMEM),            # bias  (scalar)
            pl.BlockSpec((tile_r, D), lambda i: (i, 0)),      # x tile
        ],
        out_specs=pl.BlockSpec((tile_r, D), lambda i: (i, 0)),
        input_output_aliases={2: 0},                          # in-place on activation
        compiler_params=pltpu.CompilerParams(
            dimension_semantics=("parallel",),                # rows split across TCs (v7x)
            vmem_limit_bytes=vmem_limit,
        ),
        cost_estimate=cost,
    )(alpha, bias, x2)

    return out.reshape(orig_shape)


# ------------------------------ Decoder glue ------------------------------ #
class Decoder:
    """Mirrors the PyTorch Decoder: apply layers, then Pallas LayerNorm."""

    def __init__(self, layers):
        # TODO(synk): decoder-layer internals are not defined by the reference
        # module (supplied externally as nn.ModuleList); fusing the last
        # layer's residual add into the LN kernel would cut HBM traffic ~40%
        # but requires knowledge of the layer structure, so layers stay as
        # plain-JAX callables.
        self.layers = layers
        # LayerNormalization params (nn.Parameter(torch.ones(1)/zeros(1)))
        self.alpha = jnp.ones((1,), jnp.float32)
        self.bias = jnp.zeros((1,), jnp.float32)
        self.epsilon = 1e-6

    def __call__(self, x, encoder_output, source_mask, target_mask):
        for layer in self.layers:
            x = layer(x, encoder_output, source_mask, target_mask)
        return layer_norm_pallas(x, self.alpha, self.bias, self.epsilon)


# Pure-JAX reference for correctness checking (matches torch semantics).
def _layernorm_ref(x, alpha, bias, eps=1e-6):
    mean = jnp.mean(x, axis=-1, keepdims=True)
    d = x.shape[-1]
    var = jnp.sum((x - mean) ** 2, axis=-1, keepdims=True) / (d - 1)
    std = jnp.sqrt(var)
    return alpha[0] * (x - mean) / (std + eps) + bias[0]


if __name__ == "__main__":
    key = jax.random.PRNGKey(0)
    # d_model = 128 keeps the output lane-dense (last dim multiple of 128).
    batch, seq, d_model = 2, 8, 128

    k_x, k_enc = jax.random.split(key)
    x = jax.random.normal(k_x, (batch, seq, d_model), dtype=jnp.float32)
    encoder_output = jax.random.normal(k_enc, (batch, seq, d_model), dtype=jnp.float32)
    source_mask = jnp.ones((batch, 1, 1, seq), dtype=jnp.float32)
    target_mask = jnp.ones((batch, 1, seq, seq), dtype=jnp.float32)

    # Two simple deterministic placeholder layers (plain-JAX glue); the real
    # decoder layers would be passed in by the caller, as in the PyTorch code.
    def make_layer(scale):
        def layer(x, enc, src_mask, tgt_mask):
            return x + scale * enc  # residual mix, deterministic
        return layer

    decoder = Decoder(layers=[make_layer(0.5), make_layer(0.25)])

    fwd = jax.jit(lambda a, b, c, d: decoder(a, b, c, d))
    out = fwd(x, encoder_output, source_mask, target_mask)
    out = jax.block_until_ready(out)

    # Verify against pure-JAX reference of the same forward pass.
    x_ref = x + 0.5 * encoder_output
    x_ref = x_ref + 0.25 * encoder_output
    ref = _layernorm_ref(x_ref, decoder.alpha, decoder.bias, decoder.epsilon)

    assert out.shape == (batch, seq, d_model)
    # Exact divide in the kernel -> tight tolerance (only reduction-order noise).
    assert jnp.allclose(out, ref, atol=1e-5, rtol=1e-5), "mismatch vs reference"

    print("KERNEL_OK")
</pallas_src>

<mosaic_0001>
module attributes {stable_mosaic.version = 11 : i64} {
  func.func @_layernorm_kernel(%arg0: i32, %arg1: memref<1xf32, #tpu.memory_space<smem>>, %arg2: memref<1xf32, #tpu.memory_space<smem>>, %arg3: memref<8x128xf32, #tpu.memory_space<vmem>>, %arg4: memref<8x128xf32, #tpu.memory_space<vmem>>) attributes {dimension_semantics = [#tpu.dimension_semantics<parallel>], iteration_bounds = array<i64: 2>, scalar_prefetch = 0 : i64, scratch_operands = 0 : i64, tpu.core_type = #tpu.core_type<tc>, window_params = [{transform_indices = @transform_0, window_bounds = array<i64: 1>}, {transform_indices = @transform_1, window_bounds = array<i64: 1>}, {transform_indices = @transform_2, window_bounds = array<i64: 8, 128>}, {transform_indices = @transform_3, window_bounds = array<i64: 8, 128>}]} {
    %c0 = arith.constant 0 : index
    %c0_0 = arith.constant 0 : index
    %0 = vector.load %arg3[%c0, %c0_0] : memref<8x128xf32, #tpu.memory_space<vmem>>, vector<8x128xf32>
    %cst = arith.constant dense<0.000000e+00> : vector<8xf32>
    %1 = vector.multi_reduction <add>, %0, %cst [1] : vector<8x128xf32> to vector<8xf32>
    %2 = vector.shape_cast %1 : vector<8xf32> to vector<8x1xf32>
    %cst_1 = arith.constant 1.280000e+02 : f32
    %3 = vector.broadcast %cst_1 : f32 to vector<8x1xf32>
    %4 = arith.divf %2, %3 : vector<8x1xf32>
    %5 = vector.broadcast %4 : vector<8x1xf32> to vector<8x128xf32>
    %6 = arith.subf %0, %5 : vector<8x128xf32>
    %7 = arith.mulf %6, %6 : vector<8x128xf32>
    %cst_2 = arith.constant dense<0.000000e+00> : vector<8xf32>
    %8 = vector.multi_reduction <add>, %7, %cst_2 [1] : vector<8x128xf32> to vector<8xf32>
    %9 = vector.shape_cast %8 : vector<8xf32> to vector<8x1xf32>
    %cst_3 = arith.constant 1.270000e+02 : f32
    %10 = vector.broadcast %cst_3 : f32 to vector<8x1xf32>
    %11 = arith.divf %9, %10 : vector<8x1xf32>
    %12 = math.sqrt %11 : vector<8x1xf32>
    %c0_4 = arith.constant 0 : index
    %13 = memref.load %arg1[%c0_4] : memref<1xf32, #tpu.memory_space<smem>>
    %c0_5 = arith.constant 0 : index
    %14 = memref.load %arg2[%c0_5] : memref<1xf32, #tpu.memory_space<smem>>
    %cst_6 = arith.constant 9.99999997E-7 : f32
    %15 = vector.broadcast %cst_6 : f32 to vector<8x1xf32>
    %16 = arith.addf %12, %15 : vector<8x1xf32>
    %17 = vector.broadcast %13 : f32 to vector<8x1xf32>
    %18 = arith.divf %17, %16 : vector<8x1xf32>
    %19 = vector.broadcast %4 : vector<8x1xf32> to vector<8x128xf32>
    %20 = arith.subf %0, %19 : vector<8x128xf32>
    %21 = vector.broadcast %18 : vector<8x1xf32> to vector<8x128xf32>
    %22 = arith.mulf %20, %21 : vector<8x128xf32>
    %23 = vector.broadcast %14 : f32 to vector<8x128xf32>
    %24 = arith.addf %22, %23 : vector<8x128xf32>
    %c0_7 = arith.constant 0 : index
    %c0_8 = arith.constant 0 : index
    %25 = vector.load %arg4[%c0_7, %c0_8] : memref<8x128xf32, #tpu.memory_space<vmem>>, vector<8x128xf32>
    tpu.vector_store %arg4[%c0_7, %c0_8], %24 {strides = array<i32>} : memref<8x128xf32, #tpu.memory_space<vmem>>, vector<8x128xf32>,
    return
  }
  func.func @transform_0(%arg0: i32) -> i32 {
    %c0_i32 = arith.constant 0 : i32
    %c0_i32_0 = arith.constant 0 : i32
    return %c0_i32 : i32
  }
  func.func @transform_1(%arg0: i32) -> i32 {
    %c0_i32 = arith.constant 0 : i32
    %c0_i32_0 = arith.constant 0 : i32
    return %c0_i32 : i32
  }
  func.func @transform_2(%arg0: i32) -> (i32, i32) {
    %c0_i32 = arith.constant 0 : i32
    %c0_i32_0 = arith.constant 0 : i32
    return %arg0, %c0_i32 : i32, i32
  }
  func.func @transform_3(%arg0: i32) -> (i32, i32) {
    %c0_i32 = arith.constant 0 : i32
    %c0_i32_0 = arith.constant 0 : i32
    return %arg0, %c0_i32 : i32, i32
  }
}

</mosaic_0001>

<bundles_post_ra>
// kernel: _lambda_.1
= control target key start
LH: loop header
LB: loop body
LE: loop exit
PB: predicated region body
PF: predicated region fallthrough
CT: control target
= control target key end

     0   :  { %s342_s16 = smov 0   ;;  %s366_s0 = inlined_call_operand.<no memory space> [shape: f32[1], index: 0, kind: input, shape index: {}]   ;;  %s367_s1 = inlined_call_operand.<no memory space> [shape: f32[1], index: 1, kind: input, shape index: {}]   ;;  %s368_s2 = inlined_call_operand.vmem [shape: f32[16,128], index: 2, kind: input, shape index: {}, may-alias: {2,3}]   ;;  %s369_s3 = inlined_call_operand.vmem [shape: f32[16,128], index: 3, kind: output, shape index: {}, may-alias: {2,3}]  }
   0x1   :  { %8 = sst [smem:[#allocation2]] %s366_s0 }
   0x2   :  { %9 = sst [smem:[#allocation3]] %s367_s1 }
   0x3 LB: > { %s279_s17 = sadd.s32 4294967295, %s312_s16   ;;  %p283_p0 = scmp.ge.s32.totalorder %s312_s16, 1  ;;  %s312_s16 = sphi %s342_s16, %s15_s16  }
   0x4   : > { %p138_p1 = scmp.lt.s32.totalorder %s312_s16, 3 }
   0x6   : > { %p139_p2 = pnand %p283_p0, %p138_p1 }
   0x7   : > { %p160_p3 = scmp.lt.s32.totalorder (!%p139_p2), %s279_s17, 1  ;;  %s203_s20 = sld [smem:[#allocation2]] (!%p139_p2) }
   0x8   : > { %142 = sbr.rel (%p139_p2) target bundleno = 304 (0x130), region = 32  ;;  %s204_s21 = sld [smem:[#allocation3]] (!%p139_p2) }
   0xd   : > { %s371_s17 = smov (!%p160_p3, %s279_s17), 1  ;;  %v314_v1 = vmov 128.0   ;;  %v315_v12 = vmov 127.0   ;;  %v206_v39 = vstv %s203_s20 }
   0xe   : > { %s284_s0 = sshll.u32 %s371_s17, 3  ;;  %298 = vrcp.f32 %v314_v1  ;;  %v223_v44 = vstv %s204_s21 }
   0xf   : > { %s163_s19 = scalar_lea.vmem %s368_s2, %s284_s0  ;;  %300 = vrcp.f32 %v315_v12  ;;  %s167_s24 = scalar_lea.vmem %s369_s3, %s284_s0 }
  0x10   : > { %v168_v0 = vld [vmem:[%s163_s19] sm:$0xff] }
  0x11   : > { %169 = vadd.xlane.f32.xlu0 %v168_v0 }
  0x14   : > { %v299_v2 = vpop.eup %298 }
  0x15   : > { %v172_v3 = vmul.f32 128.0, %v299_v2  ;;  %vm176_vm0 = vweird.f32 %v299_v2  ;;  %v301_v13 = vpop.eup %300 }
  0x16   : > { %v184_v14 = vmul.f32 127.0, %v301_v13  ;;  %vm188_vm1 = vweird.f32 %v301_v13 }
  0x17   : > { %v173_v4 = vsub.f32 1.0, %v172_v3 }
  0x18   : > { %v185_v15 = vsub.f32 1.0, %v184_v14 }
  0x19   : > { %v174_v5 = vmul.f32 %v299_v2, %v173_v4 }
  0x1a   : > { %v186_v16 = vmul.f32 %v301_v13, %v185_v15 }
  0x1b   : > { %v175_v6 = vadd.f32 %v299_v2, %v174_v5 }
  0x1c   : > { %v187_v17 = vadd.f32 %v301_v13, %v186_v16 }
  0x1d   : > { %v177_v7 = vsel %vm176_vm0, %v299_v2, %v175_v6 }
  0x1e   : > { %v189_v18 = vsel %vm188_vm1, %v301_v13, %v187_v17 }
  0x84   : > { %v170_v8 = vpop.xlane.xlu0 %169 }
  0x85   : > { %v178_v9 = vmul.f32 %v177_v7, %v170_v8 }
  0x87   : > { %v179_v10 = vsub.f32 %v168_v0, %v178_v9 }
  0x89   : > { %v180_v11 = vmul.f32 %v179_v10, %v179_v10 }
  0x8b   : > { %181 = vadd.xlane.f32.xlu0 %v180_v11 }
  0xfe   : > { %v182_v19 = vpop.xlane.xlu0 %181 }
  0xff   : > { %v190_v20 = vmul.f32 %v189_v18, %v182_v19 }
 0x101   : > { %302 = vrsqrt.f32 %v190_v20  ;;  %vm198_vm2 = vcmp.eq.f32.partialorder %v190_v20, inf  ;;  %v201_v28 = vand.u32 2147483648, %v190_v20  ;;  %vm200_vm3 = vcmp.eq.f32.partialorder %v190_v20, 0.0 }
 0x107   : > { %v303_v21 = vpop.eup %302 }
 0x108   : > { %v192_v22 = vmul.f32 %v303_v21, %v190_v20 }
 0x10a   : > { %v193_v23 = vmul.f32 %v303_v21, %v192_v22 }
 0x10c   : > { %v194_v24 = vmul.f32 0.5, %v193_v23 }
 0x10e   : > { %v195_v25 = vsub.f32 1.5, %v194_v24 }
 0x110   : > { %v196_v26 = vmul.f32 %v303_v21, %v195_v25 }
 0x112   : > { %v197_v27 = vmul.f32 %v196_v26, %v190_v20 }
 0x114   : > { %v199_v29 = vsel %vm198_vm2, %v190_v20, %v197_v27 }
 0x115   : > { %v202_v30 = vsel %vm200_vm3, %v201_v28, %v199_v29 }
 0x116   : > { %v205_v31 = vadd.f32 1e-06, %v202_v30 }
 0x118   : > { %304 = vrcp.f32 %v205_v31  ;;  %v218_v35 = vand.u32 2147483648, %v205_v31  ;;  %v216_v37 = vand.u32 2147483647, %v205_v31  ;;  %vm212_vm5 = vweird.f32 %v205_v31 }
 0x11a   : > { %v219_v40 = vor.u32 1.1754944e-38, %v218_v35  ;;  %vm217_vm7 = vcmp.eq.f32.partialorder %v216_v37, 8.507059e+37 }
 0x11e   : > { %v305_v32 = vpop.eup %304 }
 0x11f   : > { %v208_v33 = vmul.f32 %v305_v32, %v205_v31  ;;  %vm213_vm4 = vweird.f32 %v305_v32 }
 0x120   : > { %vm214_vm6 = vmor %vm212_vm5, %vm213_vm4 }
 0x121   : > { %v209_v34 = vsub.f32 1.0, %v208_v33 }
 0x123   : > { %v210_v36 = vmul.f32 %v305_v32, %v209_v34 }
 0x125   : > { %v211_v38 = vadd.f32 %v305_v32, %v210_v36 }
 0x127   : > { %v215_v41 = vsel %vm214_vm6, %v305_v32, %v211_v38 }
 0x128   : > { %v220_v42 = vsel %vm217_vm7, %v219_v40, %v215_v41 }
 0x129   : > { %v221_v43 = vmul.f32 %v220_v42, %v206_v39 }
 0x12b   : > { %v222_v45 = vmul.f32 %v221_v43, %v179_v10 }
 0x12d   : > { %v224_v46 = vadd.f32 %v223_v44, %v222_v45 }
 0x12f   : > { %225 = vst [vmem:[%s167_s24] sm:$0xff] %v224_v46 }
 0x130 PF: > { %s15_s16 = sadd.s32 1, %s312_s16  }
 0x131   : > { %p12_p4 = scmp.ge.s32.totalorder %s15_s16, 4  }
 0x133   :  { %14 = sbr.rel (!%p12_p4) target bundleno = 3 (0x3), region = 62 }

</bundles_post_ra>
